<compile_context>
chip_gen: v7x
topology: tpu7x:2x2x1
jax: 0.10.0
libtpu: 0.0.40
codegen_flags: <defaults>
</compile_context>

<pallas_src>
import functools
import math

import jax
import jax.numpy as jnp
from jax import lax
from jax.experimental import pallas as pl
from jax.experimental.pallas import tpu as pltpu


def _i32(v: int) -> jnp.int32:
    """int32 constant with two's-complement wraparound (for hash constants)."""
    return jnp.int32(v - (1 << 32) if v >= (1 << 31) else v)


def _round_up(x: int, m: int) -> int:
    return ((x + m - 1) // m) * m


# ----------------------------- kernels --------------------------------------


def _broadcast_pe(x, pe_ref, batch):
    """Return a pe tile broadcastable against x (handles both layouts)."""
    pe = pe_ref[...]
    if x.ndim == 2 and batch > 1:
        # Flattened layout: x is (tS, B*E), pe tile is (tS, E) -> repeat along lanes.
        pe = jnp.concatenate([pe] * batch, axis=-1)
    # 3-D layout: x is (tS, B, E), pe tile is (tS, 1, E) -> broadcasts in the add.
    return pe


def _pe_add_kernel(x_ref, pe_ref, o_ref, *, batch):
    # Eval mode: out = x + pe. Pure HBM-bound streaming add.
    x = x_ref[...]
    o_ref[...] = x + _broadcast_pe(x, pe_ref, batch)


def _pe_add_dropout_kernel(seed_ref, x_ref, pe_ref, o_ref, *, batch, rate):
    # Training mode: inverted dropout fused into the same HBM pass.
    x = x_ref[...]
    y = x + _broadcast_pe(x, pe_ref, batch)

    # Global element index (tile-size independent), then murmur3 fmix32 mixing.
    shape = y.shape
    row = lax.broadcasted_iota(jnp.int32, shape, 0) + pl.program_id(0) * shape[0]
    if y.ndim == 2:
        col = lax.broadcasted_iota(jnp.int32, shape, 1)
        idx = row * jnp.int32(shape[1]) + col
    else:
        b = lax.broadcasted_iota(jnp.int32, shape, 1)
        e = lax.broadcasted_iota(jnp.int32, shape, 2)
        idx = (row * jnp.int32(shape[1]) + b) * jnp.int32(shape[2]) + e

    h = idx ^ (seed_ref[0] * _i32(0x9E3779B9))
    h = (h ^ lax.shift_right_logical(h, jnp.int32(16))) * _i32(0x85EBCA6B)
    h = (h ^ lax.shift_right_logical(h, jnp.int32(13))) * _i32(0xC2B2AE35)
    h = h ^ lax.shift_right_logical(h, jnp.int32(16))

    # Integer-threshold compare: P(keep) = 1 - rate (23-bit granularity).
    threshold = jnp.int32(int(rate * (1 << 23)))
    keep = jnp.bitwise_and(h, jnp.int32((1 << 23) - 1)) >= threshold

    scale = jnp.asarray(1.0 / (1.0 - rate), dtype=y.dtype)
    o_ref[...] = jnp.where(keep, y * scale, jnp.zeros((), dtype=y.dtype))


# ----------------------------- wrapper ---------------------------------------


def make_pos_embedding(emb_size: int, maxlen: int) -> jnp.ndarray:
    """Deterministic sinusoidal positional embedding, identical to the torch init."""
    den = jnp.exp(-jnp.arange(0, emb_size, 2, dtype=jnp.float32)
                  * (math.log(10000.0) / emb_size))
    pos = jnp.arange(0, maxlen, dtype=jnp.float32).reshape(maxlen, 1)
    pe = jnp.zeros((maxlen, emb_size), dtype=jnp.float32)
    pe = pe.at[:, 0::2].set(jnp.sin(pos * den))
    pe = pe.at[:, 1::2].set(jnp.cos(pos * den))
    return pe  # (maxlen, emb_size)


def positional_encoding_forward(token_embedding: jnp.ndarray,
                                pos_embedding: jnp.ndarray,
                                *,
                                dropout_rate: float = 0.0,
                                train: bool = False,
                                seed: int = 0) -> jnp.ndarray:
    """token_embedding: (S, B, E); pos_embedding: (maxlen, E) or (maxlen, 1, E)."""
    S, B, E = token_embedding.shape
    if pos_embedding.ndim == 3:
        pos_embedding = pos_embedding[:, 0, :]          # (maxlen, E)
    maxlen, pe_E = pos_embedding.shape
    assert pe_E == E, f"emb_size mismatch {pe_E} vs {E}"
    assert S <= maxlen, f"seq_len {S} exceeds maxlen {maxlen}"

    dtype = token_embedding.dtype
    itemsize = jnp.dtype(dtype).itemsize
    pe = pos_embedding.astype(dtype)     # stream pe in the activation dtype

    subl = max(8, 32 // itemsize)        # sublane multiple for this dtype
    lane = 128
    target_x_tile = 8 << 20              # ~8 MiB of x per tile (>=95% HBM roofline)
    vmem_cap = 44 << 20                  # v7x-safe (64 MiB physical VMEM)

    flatten = (B < 8) and (S >= 8)       # lane/sublane-dense layout for small batch
    BE = B * E

    if flatten:
        x_row = _round_up(BE, lane) * itemsize                       # padded bytes / S-row
        pe_row = _round_up(E, lane) * itemsize
        tS = max(8, (min(S, max(1, target_x_tile // x_row)) // 8) * 8)
        step = 8                                                     # (8,128) block rule
    else:
        x_row = _round_up(B, subl) * _round_up(E, lane) * itemsize
        pe_row = subl * _round_up(E, lane) * itemsize
        tS = max(1, min(S, max(1, target_x_tile // x_row)))
        step = 1

    # Shrink tile until x/out double-buffers + pe double-buffer fit the VMEM budget.
    while True:
        vmem_needed = 4 * tS * x_row + 2 * tS * pe_row + (2 << 20)
        if vmem_needed <= vmem_cap or tS <= step:
            break
        tS = max(step, (tS // 2 // step) * step)

    grid = (pl.cdiv(S, tS),)
    compiler_params = pltpu.CompilerParams(
        dimension_semantics=("parallel",),
        vmem_limit_bytes=int(min(max(vmem_needed, 4 << 20), 48 << 20)))

    apply_dropout = bool(train) and float(dropout_rate) > 0.0

    if flatten:
        x_in = token_embedding.reshape(S, BE)           # metadata-only reshape
        pe_in = pe                                       # (maxlen, E)
        x_block, pe_block = (tS, BE), (tS, E)
        idx = (lambda s, seed_ref: (s, 0)) if apply_dropout else (lambda s: (s, 0))
        out_shape = jax.ShapeDtypeStruct((S, BE), dtype)
    else:
        x_in = token_embedding
        pe_in = pe[:, None, :]                           # (maxlen, 1, E)
        x_block, pe_block = (tS, B, E), (tS, 1, E)
        idx = (lambda s, seed_ref: (s, 0, 0)) if apply_dropout else (lambda s: (s, 0, 0))
        out_shape = jax.ShapeDtypeStruct((S, B, E), dtype)

    in_specs = [pl.BlockSpec(x_block, idx), pl.BlockSpec(pe_block, idx)]
    out_spec = pl.BlockSpec(x_block, idx)

    if not apply_dropout:
        kernel = functools.partial(_pe_add_kernel, batch=B)
        grid_spec = pltpu.PrefetchScalarGridSpec(
            num_scalar_prefetch=0, grid=grid,
            in_specs=in_specs, out_specs=out_spec)
        out = pl.pallas_call(
            kernel, out_shape=out_shape, grid_spec=grid_spec,
            compiler_params=compiler_params)(x_in, pe_in)
    else:
        kernel = functools.partial(_pe_add_dropout_kernel,
                                   batch=B, rate=float(dropout_rate))
        grid_spec = pltpu.PrefetchScalarGridSpec(
            num_scalar_prefetch=1, grid=grid,
            in_specs=in_specs, out_specs=out_spec)
        seed_arr = jnp.asarray([seed], dtype=jnp.int32)
        out = pl.pallas_call(
            kernel, out_shape=out_shape, grid_spec=grid_spec,
            compiler_params=compiler_params)(seed_arr, x_in, pe_in)

    return out.reshape(S, B, E) if flatten else out


# ----------------------------- demo / checks ---------------------------------


if __name__ == "__main__":
    emb_size = 32
    maxlen = 16
    seq_len = 8
    batch = 2
    dropout_p = 0.1

    key = jax.random.PRNGKey(0)
    x = jax.random.normal(key, (seq_len, batch, emb_size), dtype=jnp.float32)
    pe = make_pos_embedding(emb_size, maxlen)           # (maxlen, emb_size)
    pe_sliced = pe[:seq_len][:, None, :]                # reference-only slice

    # 1) Eval mode (dropout = identity), f32: exact check vs plain-JAX reference.
    out = jax.block_until_ready(positional_encoding_forward(x, pe))
    ref = x + pe_sliced
    assert out.shape == (seq_len, batch, emb_size)
    assert jnp.allclose(out, ref, atol=1e-6), "eval-mode mismatch vs reference"

    # 2) bf16 activations (pe streamed and added in bf16).
    x_bf16 = x.astype(jnp.bfloat16)
    out_bf16 = jax.block_until_ready(positional_encoding_forward(x_bf16, pe))
    ref_bf16 = x_bf16 + pe_sliced.astype(jnp.bfloat16)
    assert out_bf16.dtype == jnp.bfloat16
    assert jnp.allclose(out_bf16.astype(jnp.float32),
                        ref_bf16.astype(jnp.float32), atol=6e-2), "bf16 mismatch"

    # 3) Training mode: dropout fused in-kernel (inverted dropout, scale 1/(1-p)).
    out_tr = jax.block_until_ready(
        positional_encoding_forward(x, pe, dropout_rate=dropout_p,
                                    train=True, seed=1234))
    assert out_tr.shape == (seq_len, batch, emb_size)
    scale = 1.0 / (1.0 - dropout_p)
    consistent = jnp.where(out_tr == 0.0, True,
                           jnp.isclose(out_tr, ref * scale, atol=1e-5, rtol=1e-5))
    assert bool(jnp.all(consistent)), "training-mode dropout output inconsistent"
    n_zero = int(jnp.sum(out_tr == 0.0))
    assert 0 < n_zero < out_tr.size // 2, "dropout mask fraction implausible"

    # 4) Exercise the 3-D (B >= 8) path as well.
    xb = jax.random.normal(jax.random.PRNGKey(1),
                           (seq_len, 8, emb_size), dtype=jnp.float32)
    outb = jax.block_until_ready(positional_encoding_forward(xb, pe))
    assert jnp.allclose(outb, xb + pe_sliced, atol=1e-6), "B>=8 path mismatch"

    print("KERNEL_OK")
</pallas_src>

<mosaic_0001>
module attributes {stable_mosaic.version = 11 : i64} {
  func.func @_pe_add_kernel(%arg0: i32, %arg1: memref<8x64xf32, #tpu.memory_space<vmem>>, %arg2: memref<8x32xf32, #tpu.memory_space<vmem>>, %arg3: memref<8x64xf32, #tpu.memory_space<vmem>>) attributes {dimension_semantics = [#tpu.dimension_semantics<parallel>], iteration_bounds = array<i64: 1>, scalar_prefetch = 0 : i64, scratch_operands = 0 : i64, tpu.core_type = #tpu.core_type<tc>, window_params = [{transform_indices = @transform_0, window_bounds = array<i64: 8, 64>}, {transform_indices = @transform_1, window_bounds = array<i64: 8, 32>}, {transform_indices = @transform_2, window_bounds = array<i64: 8, 64>}]} {
    %c0 = arith.constant 0 : index
    %c0_0 = arith.constant 0 : index
    %0 = vector.load %arg1[%c0, %c0_0] : memref<8x64xf32, #tpu.memory_space<vmem>>, vector<8x64xf32>
    %c0_1 = arith.constant 0 : index
    %c0_2 = arith.constant 0 : index
    %1 = vector.load %arg2[%c0_1, %c0_2] : memref<8x32xf32, #tpu.memory_space<vmem>>, vector<8x32xf32>
    %2 = tpu.concatenate %1, %1 in 1 : vector<8x32xf32>, vector<8x32xf32> -> vector<8x64xf32>
    %3 = arith.addf %0, %2 : vector<8x64xf32>
    %c0_3 = arith.constant 0 : index
    %c0_4 = arith.constant 0 : index
    %4 = vector.load %arg3[%c0_3, %c0_4] : memref<8x64xf32, #tpu.memory_space<vmem>>, vector<8x64xf32>
    tpu.vector_store %arg3[%c0_3, %c0_4], %3 {strides = array<i32>} : memref<8x64xf32, #tpu.memory_space<vmem>>, vector<8x64xf32>,
    return
  }
  func.func @transform_0(%arg0: i32) -> (i32, i32) {
    %c0_i32 = arith.constant 0 : i32
    %c0_i32_0 = arith.constant 0 : i32
    return %arg0, %c0_i32 : i32, i32
  }
  func.func @transform_1(%arg0: i32) -> (i32, i32) {
    %c0_i32 = arith.constant 0 : i32
    %c0_i32_0 = arith.constant 0 : i32
    return %arg0, %c0_i32 : i32, i32
  }
  func.func @transform_2(%arg0: i32) -> (i32, i32) {
    %c0_i32 = arith.constant 0 : i32
    %c0_i32_0 = arith.constant 0 : i32
    return %arg0, %c0_i32 : i32, i32
  }
}

</mosaic_0001>

<bundles_post_ra>
// kernel: tpu_custom_call.1
= control target key start
LH: loop header
LB: loop body
LE: loop exit
PB: predicated region body
PF: predicated region fallthrough
CT: control target
= control target key end

     0   :  { %7 = vsyncpa [#allocation3], 0  ;;  %s204_s0 = inlined_call_operand.hbm [shape: f32[8,64], index: 0, kind: input, shape index: {}]   ;;  %s205_s1 = inlined_call_operand.hbm [shape: f32[16,32], index: 1, kind: input, shape index: {}]   ;;  %s206_s2 = inlined_call_operand.hbm [shape: f32[8,64], index: 2, kind: output, shape index: {}]  }
   0x1   :  { %8 = vsyncpa [#allocation6], 0 }
   0x2   :  { %9 = vsyncpa [#allocation4], 0  ;;  %s139_s9 = smov [#allocation2]   ;;  %s140_s11 = smov [#allocation5]  }
   0x3   :  { %s16_s10 = sshll.u32 %s139_s9, 4  ;;  %s26_s12 = sshll.u32 %s140_s11, 4  ;;  %s17_s10 = int_to_ptr.vmem [resolvable:$true] %s16_s10  ;;  %s158_s12 = int_to_ptr.vmem [resolvable:$true] %s26_s12 }
   0x4   :  { %s67_s15 = scalar_lea.hbm %s204_s0, 128 }
   0x5   :  { %p68_p0 = scmp.ne.s32.totalorder %s204_s0, %s67_s15  ;;  %p71_p1 = scmp.lt.u32.totalorder %s67_s15, %s204_s0 }
   0x7   :  { %p73_p2 = pnand %p71_p1, %p68_p0 }
   0x9   :  { %76 = shalt.err (!%p73_p2)
}
   0xa   :  { %s77_s20 = scalar_lea.vmem %s17_s10, 128  ;;  %p82_p4 = scmp.lt.s32.totalorder %s17_s10, %s17_s10 }
   0xb   :  { %p78_p3 = scmp.ne.s32.totalorder %s17_s10, %s77_s20  ;;  %p83_p5 = scmp.lt.s32.totalorder %s77_s20, %s77_s20 }
   0xd   :  { %p84_p6 = por %p83_p5, %p82_p4 }
   0xf   :  { %p85_p7 = pnand %p84_p6, %p78_p3 }
  0x11   :  { %88 = shalt.err (!%p85_p7)
}
  0x12   :  { %19 = dma.hbm_to_vmem [thread:$0]  %s204_s0, 128, %s17_s10, [#allocation3]  }
  0x13   :  { %s89_s25 = scalar_lea.hbm %s205_s1, 128  ;;  %s91_s30 = scalar_lea.hbm %s205_s1, 256 }
  0x14   :  { %p90_p8 = scmp.ne.s32.totalorder %s205_s1, %s89_s25  ;;  %p92_p9 = scmp.lt.u32.totalorder %s91_s30, %s89_s25 }
  0x15   :  { %p93_p10 = scmp.lt.u32.totalorder %s89_s25, %s205_s1 }
  0x17   :  { %p94_p11 = por %p93_p10, %p92_p9 }
  0x19   :  { %p95_p12 = pnand %p94_p11, %p90_p8 }
  0x1b   :  { %98 = shalt.err (!%p95_p12)
}
  0x1c   :  { %s99_s0 = scalar_lea.vmem %s158_s12, 128  ;;  %p104_p0 = scmp.lt.s32.totalorder %s158_s12, %s158_s12 }
  0x1d   :  { %p100_p13 = scmp.ne.s32.totalorder %s158_s12, %s99_s0  ;;  %p105_p1 = scmp.lt.s32.totalorder %s99_s0, %s99_s0 }
  0x1f   :  { %p106_p2 = por %p105_p1, %p104_p0 }
  0x21   :  { %p107_p3 = pnand %p106_p2, %p100_p13 }
  0x23   :  { %110 = shalt.err (!%p107_p3)
}
  0x24   :  { %29 = dma.hbm_to_vmem [thread:$0]  %s205_s1, 128, %s158_s12, [#allocation6]  }
  0x25   :  { %133 = dma.done.wait [#allocation3], 128  }
  0x26   :  { %134 = vsyncadd [#allocation3], 4294967168 }
  0x27   :  { %135 = dma.done.wait [#allocation6], 128  }
  0x28   :  { %136 = vsyncadd [#allocation6], 4294967168  ;;  %v37_v0 = vld [vmem:[#allocation5] sm:$0xff]  ;;  %s141_s7 = smov 32   ;;  %vm42_vm0 = vcmask 261120   ;;  %v36_v1 = vld [vmem:[#allocation2] sm:$0xff] }
  0x29   :  { %39 = vrot.lane.b32.xlu0 %v37_v0, %s141_s7  ;;  %s142_s8 = smov [#allocation7]   ;;  %vm45_vm1 = vcmask 523264  }
  0x2a   :  { %s53_s9 = sshll.u32 %s142_s8, 4  ;;  %s54_s9 = int_to_ptr.vmem [resolvable:$true] %s53_s9 }
  0x2b   :  { %s111_s10 = scalar_lea.vmem %s54_s9, 128  ;;  %p116_p5 = scmp.lt.s32.totalorder %s54_s9, %s54_s9 }
  0x2c   :  { %p112_p4 = scmp.ne.s32.totalorder %s54_s9, %s111_s10  ;;  %p117_p6 = scmp.lt.s32.totalorder %s111_s10, %s111_s10 }
  0x2e   :  { %p118_p7 = por %p117_p6, %p116_p5 }
  0x30   :  { %p119_p8 = pnand %p118_p7, %p112_p4 }
  0x9b   :  { %v40_v2 = vpop.permute.xlu0 %39 }
  0x9c   :  { %v43_v3 = vsel %vm42_vm0, %v37_v0, %v40_v2 }
  0x9d   :  { %v44_v4 = vadd.f32 %v43_v3, %v36_v1 }
  0x9f   :  { %46 = vst.msk [vmem:[#allocation7] sm:$0xff] %vm45_vm1, %v44_v4 }
  0xa0   :  { %122 = shalt.err (!%p119_p8)
}
  0xa1   :  { %s123_s12 = scalar_lea.hbm %s206_s2, 128 }
  0xa2   :  { %p124_p9 = scmp.ne.s32.totalorder %s206_s2, %s123_s12  ;;  %p127_p10 = scmp.lt.u32.totalorder %s123_s12, %s206_s2 }
  0xa4   :  { %p129_p11 = pnand %p127_p10, %p124_p9 }
  0xa6   :  { %132 = shalt.err (!%p129_p11)
}
  0xa7   :  { %56 = dma.vmem_to_hbm [thread:$0]  %s54_s9, 128, %s206_s2, [#allocation4]  }
  0xa8   :  { %137 = dma.done.wait [#allocation4], 128  }
  0xa9   :  { %138 = vsyncadd [#allocation4], 4294967168 }
  0xaa   :  { %60 = vsyncpa [#allocation3], 1 }
  0xab   :  { %61 = vsyncpa [#allocation6], 1 }
  0xac   :  { %62 = vsyncpa [#allocation4], 1 }

</bundles_post_ra>
